<compile_context>
chip_gen: v7x
topology: tpu7x:2x2x1
jax: 0.10.0
libtpu: 0.0.40
codegen_flags: <defaults>
</compile_context>

<pallas_src>
import functools

import jax
import jax.numpy as jnp
from jax import lax
from jax.experimental import pallas as pl
from jax.experimental.pallas import tpu as pltpu


def _round_up(x, m):
    return ((x + m - 1) // m) * m


# ---------------------------------------------------------------------------
# Fold the 2x nearest-neighbor upsample into the 3x3 conv weights.
# Output pixel (2a+dy, 2b+dx) of conv3x3(upsample2(x)) reads x rows/cols
# {a-1+ty} / {b-1+tx}; the tap -> kernel-coefficient map per phase is linear:
_A = jnp.array([[[1., 0., 0.],     # dy=0: ty=0 <- ky{0}, ty=1 <- ky{1,2}
                 [0., 1., 1.],
                 [0., 0., 0.]],
                [[0., 0., 0.],     # dy=1: ty=1 <- ky{0,1}, ty=2 <- ky{2}
                 [1., 1., 0.],
                 [0., 0., 1.]]], jnp.float32)   # indexed [dy, ty, ky]


def _phase_weights(w):
    """w: (3,3,Cin,Cout) -> (3,3,Cin,4*Cout); column block p=2*dy+dx produces
    output phase (dy, dx) from a plain 3x3/pad=1 conv on the ORIGINAL image."""
    kh, kw, cin, cout = w.shape
    assert kh == 3 and kw == 3
    wp = jnp.einsum('ptk,qsl,klco->tscpqo', _A, _A, w)
    return wp.reshape(3, 3, cin, 4 * cout)


# ---------------------------------------------------------------------------
# Pallas kernel: one output row (all images at once) per grid step.
#   x0/x1/x2 : row-shifted views of the padded bf16 NHWC image (N,1,W+2,Cin)
#   w        : resident phase weights (9, Cin, 4*Cout), bf16
#   o        : (N, 1, W, 4*Cout) bf16, fused ReLU
# ---------------------------------------------------------------------------

def _upconv_row_kernel(x0_ref, x1_ref, x2_ref, w_ref, o_ref, *, width):
    n = x0_ref.shape[0]
    cin = x0_ref.shape[3]
    cols = o_ref.shape[3]
    m = n * width
    rows = (x0_ref[...][:, 0], x1_ref[...][:, 0], x2_ref[...][:, 0])  # (N,W+2,Cin)

    acc = None
    for ty in range(3):
        row = rows[ty]
        for tx in range(3):
            # Static sublane slice = horizontal tap; merge (N, W) into the
            # matmul M dim (free relayout when W % 8 == 0, true here).
            tap = row[:, tx:tx + width, :].reshape(m, cin)
            part = jnp.dot(tap, w_ref[3 * ty + tx],
                           preferred_element_type=jnp.float32)
            acc = part if acc is None else acc + part

    y = jnp.maximum(acc, 0.0).astype(o_ref.dtype)
    o_ref[...] = y.reshape(n, 1, width, cols)


def decoder_block_forward(x_nchw, w_hwio):
    """DecoderBlock.forward: ReLU(conv3x3(upsample_nearest(x, 2))); NCHW in/out."""
    n, cin, h, w = x_nchw.shape
    assert w_hwio.shape[:3] == (3, 3, cin)
    cout = w_hwio.shape[3]
    cols = 4 * cout
    cin_p = _round_up(cin, 16)            # bf16 sublane-packing friendly K

    # NHWC bf16; cast BEFORE the (single) pad so only a half-width input copy
    # is ever materialized; conv halo pad + channel pad in one op.
    x = jnp.transpose(x_nchw, (0, 2, 3, 1)).astype(jnp.bfloat16)
    xp = jnp.pad(x, ((0, 0), (1, 1), (1, 1), (0, cin_p - cin)))  # (N,H+2,W+2,Cin_p)

    wp = _phase_weights(w_hwio).reshape(9, cin, cols)
    wp = jnp.pad(wp, ((0, 0), (0, cin_p - cin), (0, 0))).astype(jnp.bfloat16)

    # VMEM: 3 double-buffered input row streams + resident weights +
    # double-buffered bf16 output row + f32 accumulator; v7x-safe ceiling.
    row_b = n * (w + 2) * cin_p * 2
    vmem_est = 6 * row_b + 2 * wp.size * 2 + 2 * n * w * cols * 2 + n * w * cols * 4
    vmem_limit = int(min(max(2 * vmem_est, 8 << 20), 48 << 20))

    y = pl.pallas_call(
        functools.partial(_upconv_row_kernel, width=w),
        out_shape=jax.ShapeDtypeStruct((n, h, w, cols), jnp.bfloat16),
        grid_spec=pltpu.PrefetchScalarGridSpec(
            num_scalar_prefetch=0,
            grid=(h,),                            # one output row per step
            in_specs=[
                pl.BlockSpec((n, 1, w + 2, cin_p), lambda r: (0, r, 0, 0)),
                pl.BlockSpec((n, 1, w + 2, cin_p), lambda r: (0, r + 1, 0, 0)),
                pl.BlockSpec((n, 1, w + 2, cin_p), lambda r: (0, r + 2, 0, 0)),
                pl.BlockSpec((9, cin_p, cols), lambda r: (0, 0, 0)),  # resident
            ],
            out_specs=pl.BlockSpec((n, 1, w, cols), lambda r: (0, r, 0, 0)),
        ),
        compiler_params=pltpu.CompilerParams(
            dimension_semantics=("parallel",),
            vmem_limit_bytes=vmem_limit,
        ),
        cost_estimate=pl.CostEstimate(
            flops=2 * n * h * w * 9 * cin_p * cols,
            transcendentals=0,
            bytes_accessed=(3 * n * (h + 2) * (w + 2) * cin_p * 2   # 3x input re-read
                            + wp.size * 2                           # resident weights
                            + n * h * w * cols * 2),                # bf16 output
        ),
    )(xp, xp, xp, wp)

    # depth-to-space (phase p=2*dy+dx -> pixel (2a+dy, 2b+dx)) fused with the
    # NHWC->NCHW conversion into a single 6-D transpose; f32 only at the end.
    # TODO(synk): widths that are not a multiple of 8 (e.g. 7x7 bottleneck maps)
    # would prefer a per-image dot path instead of the (N,W)->(N*W) merge.
    y = y.reshape(n, h, w, 2, 2, cout)
    out = jnp.transpose(y, (0, 5, 1, 3, 2, 4)).reshape(n, cout, 2 * h, 2 * w)
    return out.astype(x_nchw.dtype)


# ---------------------------------------------------------------------------

if __name__ == "__main__":
    num_in, num_out = 4, 8
    batch, height, width = 2, 16, 16

    kx, kw = jax.random.split(jax.random.PRNGKey(0))
    x = jax.random.normal(kx, (batch, num_in, height, width), jnp.float32)
    std = (2.0 / (9 * num_in)) ** 0.5
    w = jax.random.normal(kw, (3, 3, num_in, num_out), jnp.float32) * std

    fwd = jax.jit(decoder_block_forward)
    out = jax.block_until_ready(fwd(x, w))
    assert out.shape == (batch, num_out, 2 * height, 2 * width), out.shape
    assert bool(jnp.all(jnp.isfinite(out)))

    # Reference semantics: nearest upsample x2 -> conv3x3(pad=1, no bias) -> ReLU.
    x_nhwc = jnp.transpose(x, (0, 2, 3, 1))
    up = jnp.repeat(jnp.repeat(x_nhwc, 2, axis=1), 2, axis=2)
    ref = lax.conv_general_dilated(
        up, w, window_strides=(1, 1), padding=((1, 1), (1, 1)),
        dimension_numbers=('NHWC', 'HWIO', 'NHWC'))
    ref = jnp.transpose(jnp.maximum(ref, 0.0), (0, 3, 1, 2))
    err = float(jnp.max(jnp.abs(out - ref)))
    tol = float(2e-2 * jnp.max(jnp.abs(ref)) + 1e-3)
    assert err <= tol, (err, tol)

    print("KERNEL_OK")
</pallas_src>

<mosaic_0001>
module attributes {stable_mosaic.version = 11 : i64} {
  func.func @_upconv_row_kernel(%arg0: i32, %arg1: memref<2x1x18x16xbf16, #tpu.memory_space<vmem>>, %arg2: memref<2x1x18x16xbf16, #tpu.memory_space<vmem>>, %arg3: memref<2x1x18x16xbf16, #tpu.memory_space<vmem>>, %arg4: memref<9x16x32xbf16, #tpu.memory_space<vmem>>, %arg5: memref<2x1x16x32xbf16, #tpu.memory_space<vmem>>) attributes {dimension_semantics = [#tpu.dimension_semantics<parallel>], iteration_bounds = array<i64: 16>, scalar_prefetch = 0 : i64, scratch_operands = 0 : i64, tpu.core_type = #tpu.core_type<tc>, window_params = [{transform_indices = @transform_0, window_bounds = array<i64: 2, 1, 18, 16>}, {transform_indices = @transform_1, window_bounds = array<i64: 2, 1, 18, 16>}, {transform_indices = @transform_2, window_bounds = array<i64: 2, 1, 18, 16>}, {pipeline_mode = #tpu.pipeline_mode<synchronous>, transform_indices = @transform_3, window_bounds = array<i64: 9, 16, 32>}, {transform_indices = @transform_4, window_bounds = array<i64: 2, 1, 16, 32>}]} {
    %c0 = arith.constant 0 : index
    %c0_0 = arith.constant 0 : index
    %c0_1 = arith.constant 0 : index
    %c0_2 = arith.constant 0 : index
    %0 = vector.load %arg1[%c0, %c0_0, %c0_1, %c0_2] : memref<2x1x18x16xbf16, #tpu.memory_space<vmem>>, vector<2x1x18x16xbf16>
    %1 = vector.shape_cast %0 : vector<2x1x18x16xbf16> to vector<2x18x16xbf16>
    %c0_3 = arith.constant 0 : index
    %c0_4 = arith.constant 0 : index
    %c0_5 = arith.constant 0 : index
    %c0_6 = arith.constant 0 : index
    %2 = vector.load %arg2[%c0_3, %c0_4, %c0_5, %c0_6] : memref<2x1x18x16xbf16, #tpu.memory_space<vmem>>, vector<2x1x18x16xbf16>
    %3 = vector.shape_cast %2 : vector<2x1x18x16xbf16> to vector<2x18x16xbf16>
    %c0_7 = arith.constant 0 : index
    %c0_8 = arith.constant 0 : index
    %c0_9 = arith.constant 0 : index
    %c0_10 = arith.constant 0 : index
    %4 = vector.load %arg3[%c0_7, %c0_8, %c0_9, %c0_10] : memref<2x1x18x16xbf16, #tpu.memory_space<vmem>>, vector<2x1x18x16xbf16>
    %5 = vector.shape_cast %4 : vector<2x1x18x16xbf16> to vector<2x18x16xbf16>
    %6 = vector.extract_strided_slice %1 {offsets = [0, 0, 0], sizes = [2, 16, 16], strides = [1, 1, 1]} : vector<2x18x16xbf16> to vector<2x16x16xbf16>
    %7 = vector.shape_cast %6 : vector<2x16x16xbf16> to vector<32x16xbf16>
    %c0_11 = arith.constant 0 : index
    %c0_12 = arith.constant 0 : index
    %c0_13 = arith.constant 0 : index
    %8 = vector.load %arg4[%c0_11, %c0_12, %c0_13] : memref<9x16x32xbf16, #tpu.memory_space<vmem>>, vector<1x16x32xbf16>
    %9 = vector.shape_cast %8 : vector<1x16x32xbf16> to vector<16x32xbf16>
    %cst = arith.constant dense<0.000000e+00> : vector<32x32xf32>
    %10 = tpu.matmul %7, %9, %cst {dimension_numbers = #tpu.dot_dimension_numbers<[1], [0], [0], [1], [0, 0, 1, 1], [], []>} : vector<32x16xbf16>, vector<16x32xbf16>, vector<32x32xf32> -> vector<32x32xf32>
    %11 = vector.extract_strided_slice %1 {offsets = [0, 1, 0], sizes = [2, 16, 16], strides = [1, 1, 1]} : vector<2x18x16xbf16> to vector<2x16x16xbf16>
    %12 = vector.shape_cast %11 : vector<2x16x16xbf16> to vector<32x16xbf16>
    %c1 = arith.constant 1 : index
    %c0_14 = arith.constant 0 : index
    %c0_15 = arith.constant 0 : index
    %13 = vector.load %arg4[%c1, %c0_14, %c0_15] : memref<9x16x32xbf16, #tpu.memory_space<vmem>>, vector<1x16x32xbf16>
    %14 = vector.shape_cast %13 : vector<1x16x32xbf16> to vector<16x32xbf16>
    %cst_16 = arith.constant dense<0.000000e+00> : vector<32x32xf32>
    %15 = tpu.matmul %12, %14, %cst_16 {dimension_numbers = #tpu.dot_dimension_numbers<[1], [0], [0], [1], [0, 0, 1, 1], [], []>} : vector<32x16xbf16>, vector<16x32xbf16>, vector<32x32xf32> -> vector<32x32xf32>
    %16 = arith.addf %10, %15 : vector<32x32xf32>
    %17 = vector.extract_strided_slice %1 {offsets = [0, 2, 0], sizes = [2, 16, 16], strides = [1, 1, 1]} : vector<2x18x16xbf16> to vector<2x16x16xbf16>
    %18 = vector.shape_cast %17 : vector<2x16x16xbf16> to vector<32x16xbf16>
    %c2 = arith.constant 2 : index
    %c0_17 = arith.constant 0 : index
    %c0_18 = arith.constant 0 : index
    %19 = vector.load %arg4[%c2, %c0_17, %c0_18] : memref<9x16x32xbf16, #tpu.memory_space<vmem>>, vector<1x16x32xbf16>
    %20 = vector.shape_cast %19 : vector<1x16x32xbf16> to vector<16x32xbf16>
    %cst_19 = arith.constant dense<0.000000e+00> : vector<32x32xf32>
    %21 = tpu.matmul %18, %20, %cst_19 {dimension_numbers = #tpu.dot_dimension_numbers<[1], [0], [0], [1], [0, 0, 1, 1], [], []>} : vector<32x16xbf16>, vector<16x32xbf16>, vector<32x32xf32> -> vector<32x32xf32>
    %22 = arith.addf %16, %21 : vector<32x32xf32>
    %23 = vector.extract_strided_slice %3 {offsets = [0, 0, 0], sizes = [2, 16, 16], strides = [1, 1, 1]} : vector<2x18x16xbf16> to vector<2x16x16xbf16>
    %24 = vector.shape_cast %23 : vector<2x16x16xbf16> to vector<32x16xbf16>
    %c3 = arith.constant 3 : index
    %c0_20 = arith.constant 0 : index
    %c0_21 = arith.constant 0 : index
    %25 = vector.load %arg4[%c3, %c0_20, %c0_21] : memref<9x16x32xbf16, #tpu.memory_space<vmem>>, vector<1x16x32xbf16>
    %26 = vector.shape_cast %25 : vector<1x16x32xbf16> to vector<16x32xbf16>
    %cst_22 = arith.constant dense<0.000000e+00> : vector<32x32xf32>
    %27 = tpu.matmul %24, %26, %cst_22 {dimension_numbers = #tpu.dot_dimension_numbers<[1], [0], [0], [1], [0, 0, 1, 1], [], []>} : vector<32x16xbf16>, vector<16x32xbf16>, vector<32x32xf32> -> vector<32x32xf32>
    %28 = arith.addf %22, %27 : vector<32x32xf32>
    %29 = vector.extract_strided_slice %3 {offsets = [0, 1, 0], sizes = [2, 16, 16], strides = [1, 1, 1]} : vector<2x18x16xbf16> to vector<2x16x16xbf16>
    %30 = vector.shape_cast %29 : vector<2x16x16xbf16> to vector<32x16xbf16>
    %c4 = arith.constant 4 : index
    %c0_23 = arith.constant 0 : index
    %c0_24 = arith.constant 0 : index
    %31 = vector.load %arg4[%c4, %c0_23, %c0_24] : memref<9x16x32xbf16, #tpu.memory_space<vmem>>, vector<1x16x32xbf16>
    %32 = vector.shape_cast %31 : vector<1x16x32xbf16> to vector<16x32xbf16>
    %cst_25 = arith.constant dense<0.000000e+00> : vector<32x32xf32>
    %33 = tpu.matmul %30, %32, %cst_25 {dimension_numbers = #tpu.dot_dimension_numbers<[1], [0], [0], [1], [0, 0, 1, 1], [], []>} : vector<32x16xbf16>, vector<16x32xbf16>, vector<32x32xf32> -> vector<32x32xf32>
    %34 = arith.addf %28, %33 : vector<32x32xf32>
    %35 = vector.extract_strided_slice %3 {offsets = [0, 2, 0], sizes = [2, 16, 16], strides = [1, 1, 1]} : vector<2x18x16xbf16> to vector<2x16x16xbf16>
    %36 = vector.shape_cast %35 : vector<2x16x16xbf16> to vector<32x16xbf16>
    %c5 = arith.constant 5 : index
    %c0_26 = arith.constant 0 : index
    %c0_27 = arith.constant 0 : index
    %37 = vector.load %arg4[%c5, %c0_26, %c0_27] : memref<9x16x32xbf16, #tpu.memory_space<vmem>>, vector<1x16x32xbf16>
    %38 = vector.shape_cast %37 : vector<1x16x32xbf16> to vector<16x32xbf16>
    %cst_28 = arith.constant dense<0.000000e+00> : vector<32x32xf32>
    %39 = tpu.matmul %36, %38, %cst_28 {dimension_numbers = #tpu.dot_dimension_numbers<[1], [0], [0], [1], [0, 0, 1, 1], [], []>} : vector<32x16xbf16>, vector<16x32xbf16>, vector<32x32xf32> -> vector<32x32xf32>
    %40 = arith.addf %34, %39 : vector<32x32xf32>
    %41 = vector.extract_strided_slice %5 {offsets = [0, 0, 0], sizes = [2, 16, 16], strides = [1, 1, 1]} : vector<2x18x16xbf16> to vector<2x16x16xbf16>
    %42 = vector.shape_cast %41 : vector<2x16x16xbf16> to vector<32x16xbf16>
    %c6 = arith.constant 6 : index
    %c0_29 = arith.constant 0 : index
    %c0_30 = arith.constant 0 : index
    %43 = vector.load %arg4[%c6, %c0_29, %c0_30] : memref<9x16x32xbf16, #tpu.memory_space<vmem>>, vector<1x16x32xbf16>
    %44 = vector.shape_cast %43 : vector<1x16x32xbf16> to vector<16x32xbf16>
    %cst_31 = arith.constant dense<0.000000e+00> : vector<32x32xf32>
    %45 = tpu.matmul %42, %44, %cst_31 {dimension_numbers = #tpu.dot_dimension_numbers<[1], [0], [0], [1], [0, 0, 1, 1], [], []>} : vector<32x16xbf16>, vector<16x32xbf16>, vector<32x32xf32> -> vector<32x32xf32>
    %46 = arith.addf %40, %45 : vector<32x32xf32>
    %47 = vector.extract_strided_slice %5 {offsets = [0, 1, 0], sizes = [2, 16, 16], strides = [1, 1, 1]} : vector<2x18x16xbf16> to vector<2x16x16xbf16>
    %48 = vector.shape_cast %47 : vector<2x16x16xbf16> to vector<32x16xbf16>
    %c7 = arith.constant 7 : index
    %c0_32 = arith.constant 0 : index
    %c0_33 = arith.constant 0 : index
    %49 = vector.load %arg4[%c7, %c0_32, %c0_33] : memref<9x16x32xbf16, #tpu.memory_space<vmem>>, vector<1x16x32xbf16>
    %50 = vector.shape_cast %49 : vector<1x16x32xbf16> to vector<16x32xbf16>
    %cst_34 = arith.constant dense<0.000000e+00> : vector<32x32xf32>
    %51 = tpu.matmul %48, %50, %cst_34 {dimension_numbers = #tpu.dot_dimension_numbers<[1], [0], [0], [1], [0, 0, 1, 1], [], []>} : vector<32x16xbf16>, vector<16x32xbf16>, vector<32x32xf32> -> vector<32x32xf32>
    %52 = arith.addf %46, %51 : vector<32x32xf32>
    %53 = vector.extract_strided_slice %5 {offsets = [0, 2, 0], sizes = [2, 16, 16], strides = [1, 1, 1]} : vector<2x18x16xbf16> to vector<2x16x16xbf16>
    %54 = vector.shape_cast %53 : vector<2x16x16xbf16> to vector<32x16xbf16>
    %c8 = arith.constant 8 : index
    %c0_35 = arith.constant 0 : index
    %c0_36 = arith.constant 0 : index
    %55 = vector.load %arg4[%c8, %c0_35, %c0_36] : memref<9x16x32xbf16, #tpu.memory_space<vmem>>, vector<1x16x32xbf16>
    %56 = vector.shape_cast %55 : vector<1x16x32xbf16> to vector<16x32xbf16>
    %cst_37 = arith.constant dense<0.000000e+00> : vector<32x32xf32>
    %57 = tpu.matmul %54, %56, %cst_37 {dimension_numbers = #tpu.dot_dimension_numbers<[1], [0], [0], [1], [0, 0, 1, 1], [], []>} : vector<32x16xbf16>, vector<16x32xbf16>, vector<32x32xf32> -> vector<32x32xf32>
    %58 = arith.addf %52, %57 : vector<32x32xf32>
    %cst_38 = arith.constant 0.000000e+00 : f32
    %59 = vector.broadcast %cst_38 : f32 to vector<32x32xf32>
    %60 = arith.maximumf %58, %59 : vector<32x32xf32>
    %61 = arith.truncf %60 : vector<32x32xf32> to vector<32x32xbf16>
    %62 = vector.shape_cast %61 : vector<32x32xbf16> to vector<2x1x16x32xbf16>
    %c0_39 = arith.constant 0 : index
    %c0_40 = arith.constant 0 : index
    %c0_41 = arith.constant 0 : index
    %c0_42 = arith.constant 0 : index
    %63 = vector.load %arg5[%c0_39, %c0_40, %c0_41, %c0_42] : memref<2x1x16x32xbf16, #tpu.memory_space<vmem>>, vector<2x1x16x32xbf16>
    tpu.vector_store %arg5[%c0_39, %c0_40, %c0_41, %c0_42], %62 {strides = array<i32>} : memref<2x1x16x32xbf16, #tpu.memory_space<vmem>>, vector<2x1x16x32xbf16>,
    return
  }
  func.func @transform_0(%arg0: i32) -> (i32, i32, i32, i32) {
    %c0_i32 = arith.constant 0 : i32
    %c0_i32_0 = arith.constant 0 : i32
    %c0_i32_1 = arith.constant 0 : i32
    %c0_i32_2 = arith.constant 0 : i32
    return %c0_i32, %arg0, %c0_i32_0, %c0_i32_1 : i32, i32, i32, i32
  }
  func.func @transform_1(%arg0: i32) -> (i32, i32, i32, i32) {
    %c1_i32 = arith.constant 1 : i32
    %0 = arith.addi %arg0, %c1_i32 : i32
    %c0_i32 = arith.constant 0 : i32
    %c0_i32_0 = arith.constant 0 : i32
    %c0_i32_1 = arith.constant 0 : i32
    %c0_i32_2 = arith.constant 0 : i32
    return %c0_i32, %0, %c0_i32_0, %c0_i32_1 : i32, i32, i32, i32
  }
  func.func @transform_2(%arg0: i32) -> (i32, i32, i32, i32) {
    %c2_i32 = arith.constant 2 : i32
    %0 = arith.addi %arg0, %c2_i32 : i32
    %c0_i32 = arith.constant 0 : i32
    %c0_i32_0 = arith.constant 0 : i32
    %c0_i32_1 = arith.constant 0 : i32
    %c0_i32_2 = arith.constant 0 : i32
    return %c0_i32, %0, %c0_i32_0, %c0_i32_1 : i32, i32, i32, i32
  }
  func.func @transform_3(%arg0: i32) -> (i32, i32, i32) {
    %c0_i32 = arith.constant 0 : i32
    %c0_i32_0 = arith.constant 0 : i32
    %c0_i32_1 = arith.constant 0 : i32
    %c0_i32_2 = arith.constant 0 : i32
    return %c0_i32, %c0_i32_0, %c0_i32_1 : i32, i32, i32
  }
  func.func @transform_4(%arg0: i32) -> (i32, i32, i32, i32) {
    %c0_i32 = arith.constant 0 : i32
    %c0_i32_0 = arith.constant 0 : i32
    %c0_i32_1 = arith.constant 0 : i32
    %c0_i32_2 = arith.constant 0 : i32
    return %c0_i32, %arg0, %c0_i32_0, %c0_i32_1 : i32, i32, i32, i32
  }
}

</mosaic_0001>

<bundles_post_ra>
// kernel: decoder_block_forward.1
= control target key start
LH: loop header
LB: loop body
LE: loop exit
PB: predicated region body
PF: predicated region fallthrough
CT: control target
= control target key end

     0   :  { %s1865_s15 = smov 0   ;;  %s1867_s16 = smov 0   ;;  %s2226_s0 = inlined_call_operand.vmem [shape: bf16[2,18,18,16], index: 0, kind: input, shape index: {}, may-alias: {0,1,2}]   ;;  %s2227_s1 = inlined_call_operand.vmem [shape: bf16[2,18,18,16], index: 1, kind: input, shape index: {}, may-alias: {0,1,2}]   ;;  %s2228_s2 = inlined_call_operand.vmem [shape: bf16[2,18,18,16], index: 2, kind: input, shape index: {}, may-alias: {0,1,2}]   ;;  %s2229_s3 = inlined_call_operand.vmem [shape: bf16[9,16,32], index: 3, kind: input, shape index: {}]   ;;  %s2230_s4 = inlined_call_operand.vmem [shape: bf16[2,16,16,32], index: 4, kind: output, shape index: {}]  }
   0x1   :  { %s1869_s17 = smov 0   ;;  %s1871_s18 = smov 0  }
   0x2   :  { %s1873_s19 = smov 0   ;;  %s1875_s20 = smov 0  }
   0x3   :  { %s1877_s21 = smov 0  }
   0x4 LB: > { %s1493_s22 = sadd.s32 4294967295, %s1838_s21   ;;  %s1902_s23 = sadd.s32 1, %s1838_s21   ;;  %s1838_s21 = sphi %s1877_s21, %s2245_s21   ;;  %s1834_s20 = sphi %s1875_s20, %s2244_s20   ;;  %s1830_s19 = sphi %s1873_s19, %s2243_s19   ;;  %s1826_s18 = sphi %s1871_s18, %s2242_s18   ;;  %s1822_s17 = sphi %s1869_s17, %s2241_s17   ;;  %s1818_s16 = sphi %s1867_s16, %s2240_s16   ;;  %s1814_s15 = sphi %s1865_s15, %s2239_s15  }
   0x5   : > { %s18_s24 = ssub.s32 %s1838_s21, %s1902_s23  ;;  %s21_s25 = sadd.s32 1, %s1834_s20 }
   0x6   : > { %p19_p0 = scmp.eq.s32.totalorder %s18_s24, 0  ;;  %p28_p1 = scmp.ne.s32.totalorder %s1834_s20, %s1830_s19 }
   0x7   : > { %p29_p2 = scmp.eq.s32.totalorder %s1838_s21, 0  ;;  %s45_s26 = sadd.s32 1, %s1902_s23 }
   0x8   : > { %s1912_s27 = scalar_select %p19_p0, %s1834_s20, %s21_s25  }
   0x9   : > { %p1919_p3 = por %p29_p2, %p28_p1  ;;  %s46_s29 = ssub.s32 %s1902_s23, %s45_s26 }
   0xa   : > { %p47_p4 = scmp.eq.s32.totalorder %s46_s29, 0  ;;  %s49_s30 = sadd.s32 1, %s1826_s18 }
   0xb   : > { %p56_p5 = scmp.ne.s32.totalorder %s1826_s18, %s1822_s17  ;;  %s72_s5 = sadd.s32 2, %s1838_s21 }
   0xc   : > { %s1929_s6 = scalar_select %p47_p4, %s1826_s18, %s49_s30  }
   0xd   : > { %p1933_p6 = por %p56_p5, %p29_p2  ;;  %s73_s8 = sadd.s32 2, %s1902_s23 }
   0xe   : > { %s74_s9 = ssub.s32 %s72_s5, %s73_s8  ;;  %s77_s10 = sadd.s32 1, %s1818_s16 }
   0xf   : > { %p75_p7 = scmp.eq.s32.totalorder %s74_s9, 0  ;;  %p84_p8 = scmp.ne.s32.totalorder %s1818_s16, %s1814_s15 }
  0x10   : > { %p135_p9 = scmp.eq.s32.totalorder %s1493_s22, 15  ;;  %p1496_p12 = scmp.ge.s32.totalorder %s1838_s21, 16 }
  0x11   : > { %s1944_s11 = scalar_select %p75_p7, %s1818_s16, %s77_s10  }
  0x12   : > { %p1948_p10 = por %p84_p8, %p29_p2  ;;  %p1955_p11 = por %p135_p9, %p28_p1 }
  0x13   : > { %160 = sbr.rel (%p1496_p12) target bundleno = 47 (0x2f), region = 20 }
  0x1a   : > { %163 = sbr.rel (!%p1919_p3) target bundleno = 33 (0x21), region = 24  ;;  %s165_s14 = sand.u32 (%p1919_p3), 1, %s1834_s20  }
  0x1b   : > { %s1707_s24 = smul.u32 (%p1919_p3), 12, %s1838_s21 }
  0x1c   : > { %s1706_s25 = smul.u32 (%p1919_p3), 24, %s165_s14 }
  0x1d   : > { %s170_s30 = scalar_lea.vmem (%p1919_p3), %s2226_s0, %s1707_s24 }
  0x1e   : > { %v186_v0 = vld [vmem:[%s170_s30] sm:$0xff] (%p1919_p3)   ;;  %v190_v1 = vld [vmem:[%s170_s30 + $0x8] sm:$0xf] (%p1919_p3)  ;;  %v192_v2 = vld [vmem:[%s170_s30 + $0xd8] sm:$0xff] (%p1919_p3)   ;;  %s167_s5 = scalar_lea.vmem (%p1919_p3), [#allocation2], %s1706_s25 }
  0x1f   : > { %187 = vst [vmem:[%s167_s5] sm:$0xff] (%p1919_p3), %v186_v0   ;;  %191 = vst [vmem:[%s167_s5 + $0x8] sm:$0xf] (%p1919_p3), %v190_v1  ;;  %v196_v3 = vld [vmem:[%s170_s30 + $0xe0] sm:$0xf] (%p1919_p3) }
  0x20   : > { %193 = vst [vmem:[%s167_s5 + $0xc] sm:$0xff] (%p1919_p3), %v192_v2   ;;  %197 = vst [vmem:[%s167_s5 + $0x14] sm:$0xf] (%p1919_p3), %v196_v3 }
  0x21 PF: > { %232 = sbr.rel (!%p1933_p6) target bundleno = 40 (0x28), region = 65  ;;  %s234_s28 = sand.u32 (%p1933_p6), 1, %s1826_s18  }
  0x22   : > { %s1417_s8 = smul.u32 (%p1933_p6), 12, %s1838_s21 }
  0x23   : > { %s1708_s9 = smul.u32 (%p1933_p6), 24, %s234_s28 }
  0x24   : > { %s1418_s24 = scalar_lea.vmem (%p1933_p6), %s2227_s1, %s1417_s8 }
  0x25   : > { %v1498_v4 = vld [vmem:[%s1418_s24 + $0xc] sm:$0xff] (%p1933_p6)   ;;  %v1500_v5 = vld [vmem:[%s1418_s24 + $0x14] sm:$0xf] (%p1933_p6)  ;;  %v1501_v6 = vld [vmem:[%s1418_s24 + $0xe4] sm:$0xff] (%p1933_p6)   ;;  %s236_s25 = scalar_lea.vmem (%p1933_p6), [#allocation3], %s1708_s9 }
  0x26   : > { %257 = vst [vmem:[%s236_s25] sm:$0xff] (%p1933_p6), %v1498_v4   ;;  %261 = vst [vmem:[%s236_s25 + $0x8] sm:$0xf] (%p1933_p6), %v1500_v5  ;;  %v1503_v7 = vld [vmem:[%s1418_s24 + $0xec] sm:$0xf] (%p1933_p6) }
  0x27   : > { %263 = vst [vmem:[%s236_s25 + $0xc] sm:$0xff] (%p1933_p6), %v1501_v6   ;;  %267 = vst [vmem:[%s236_s25 + $0x14] sm:$0xf] (%p1933_p6), %v1503_v7 }
  0x28 PF: > { %302 = sbr.rel (!%p1948_p10) target bundleno = 47 (0x2f), region = 106  ;;  %s304_s7 = sand.u32 (%p1948_p10), 1, %s1818_s16  }
  0x29   : > { %s1422_s26 = smul.u32 (%p1948_p10), 12, %s1838_s21 }
  0x2a   : > { %s1709_s29 = smul.u32 (%p1948_p10), 24, %s304_s7 }
  0x2b   : > { %s1423_s28 = scalar_lea.vmem (%p1948_p10), %s2228_s2, %s1422_s26 }
  0x2c   : > { %v1504_v8 = vld [vmem:[%s1423_s28 + $0x18] sm:$0xff] (%p1948_p10)   ;;  %v1506_v9 = vld [vmem:[%s1423_s28 + $0x20] sm:$0xf] (%p1948_p10)  ;;  %v1507_v10 = vld [vmem:[%s1423_s28 + $0xf0] sm:$0xff] (%p1948_p10)   ;;  %s306_s8 = scalar_lea.vmem (%p1948_p10), [#allocation4], %s1709_s29 }
  0x2d   : > { %327 = vst [vmem:[%s306_s8] sm:$0xff] (%p1948_p10), %v1504_v8   ;;  %331 = vst [vmem:[%s306_s8 + $0x8] sm:$0xf] (%p1948_p10), %v1506_v9  ;;  %v1509_v11 = vld [vmem:[%s1423_s28 + $0xf8] sm:$0xf] (%p1948_p10) }
  0x2e   : > { %333 = vst [vmem:[%s306_s8 + $0xc] sm:$0xff] (%p1948_p10), %v1507_v10   ;;  %337 = vst [vmem:[%s306_s8 + $0x14] sm:$0xf] (%p1948_p10), %v1509_v11 }
  0x2f PF: > { %p1510_p13 = scmp.ge.s32.totalorder %s1838_s21, 1  ;;  %p371_p0 = scmp.lt.s32.totalorder %s1838_s21, 17 }
  0x31   : > { %p372_p1 = pnand %p1510_p13, %p371_p0 }
  0x32   : > { %v1769_v12 = vld [vmem:[%s2229_s3 + $0x20] sm:$0xff] (!%p372_p1)   ;;  %s378_s10 = sand.u32 (!%p372_p1), 1, %s1830_s19   ;;  %v1770_v13 = vld [vmem:[%s2229_s3 + $0x8] sm:$0xff] (!%p372_p1)   ;;  %vm447_vm0 = vsmask.f32 (!%p372_p1), 3328  ;;  %s385_s7 = sand.u32 (!%p372_p1), 1, %s1822_s17  }
  0x33   : > { %375 = sbr.rel (%p372_p1) target bundleno = 358 (0x166), region = 147  ;;  %1644 = vmatprep.subr.bf16.mxu0 (!%p372_p1), %v1769_v12  ;;  %vm448_vm1 = vsmask.f32 (!%p372_p1), 7440  ;;  %1620 = vmatprep.subr.bf16.mxu1 (!%p372_p1), %v1770_v13  ;;  %v2011_v21 = vld [vmem:[%s2229_s3 + $0x28] sm:$0xff] (!%p372_p1)   ;;  %vm513_vm3 = vcmask (!%p372_p1), 130048   ;;  %v1772_v54 = vld [vmem:[%s2229_s3] sm:$0xff] (!%p372_p1)  }
  0x34   : > { %s1710_s25 = smul.u32 (!%p372_p1), 24, %s378_s10  ;;  %1645 = vmatpush3.bf16.msra.mxu0 (!%p372_p1), %v1769_v12  ;;  %1621 = vmatpush3.bf16.msra.mxu1 (!%p372_p1), %v1770_v13  ;;  %vm2039_vm2 = vmor (!%p372_p1), %vm447_vm0, %vm448_vm1  ;;  %vm642_vm4 = vcmask (!%p372_p1), 1042432   ;;  %s392_s12 = sand.u32 (!%p372_p1), 1, %s1814_s15   ;;  %vm643_vm5 = vcmask (!%p372_p1), 1046532   ;;  %vm1333_vm7 = vcmask (!%p372_p1), 257024  }
  0x35   : > { %s1711_s26 = smul.u32 (!%p372_p1), 24, %s385_s7  ;;  %1650 = vmatprep.subr.bf16.mxu0 (!%p372_p1), %v2011_v21  ;;  %1626 = vmatprep.subr.bf16.mxu1 (!%p372_p1), %v1772_v54  ;;  %vm2091_vm6 = vmor (!%p372_p1), %vm642_vm4, %vm643_vm5  ;;  %s1511_s8 = sshll.u32 (!%p372_p1), %s378_s10, 4 }
  0x36   : > { %s1993_s29 = scalar_lea.vmem (!%p372_p1), [#allocation2], %s1710_s25  ;;  %s1712_s15 = smul.u32 (!%p372_p1), 24, %s392_s12 }
  0x37   : > { %v1996_v14 = vld [vmem:[%s1993_s29] sm:$0xf] (!%p372_p1)  ;;  %v1999_v15 = vld [vmem:[%s1993_s29 + $0x4] sm:$0xf] (!%p372_p1)  ;;  %v2002_v16 = vld [vmem:[%s1993_s29 + $0x8] sm:$0x1] (!%p372_p1) }
  0x38   : > { %v451_v17 = vshrl.u32 (!%p372_p1), %v1996_v14, 16  ;;  %v454_v18 = vshll.u32 (!%p372_p1), %v1996_v14, 16  ;;  %v460_v19 = vshll.u32 (!%p372_p1), %v1999_v15, 16  ;;  %v464_v20 = vshrl.u32 (!%p372_p1), %v1999_v15, 16  ;;  %s2014_s5 = scalar_lea.vmem (!%p372_p1), [#allocation3], %s1711_s26  ;;  %s2123_s7 = scalar_lea.vmem (!%p372_p1), [#allocation4], %s1712_s15 }
  0x39   : > { %v470_v22 = vshll.u32 (!%p372_p1), %v2002_v16, 16  ;;  %v2017_v23 = vld [vmem:[%s2014_s5] sm:$0xf] (!%p372_p1)  ;;  %v2020_v24 = vld [vmem:[%s2014_s5 + $0x4] sm:$0xf] (!%p372_p1)  ;;  %s423_s12 = scalar_lea.vmem (!%p372_p1), [#allocation5], %s1511_s8 }
  0x3a   : > { %v453_v25 = vrot.slane %v451_v17, 4  ;;  %v456_v26 = vrot.slane %v454_v18, 5  ;;  %v462_v27 = vrot.slane %v460_v19, 5  ;;  %v466_v28 = vrot.slane %v464_v20, 4  ;;  %v2023_v29 = vld [vmem:[%s2014_s5 + $0x8] sm:$0x1] }
  0x3b   : > { %v472_v30 = vrot.slane %v470_v22, 5  ;;  %v812_v31 = vshrl.u32 %v2017_v23, 16  ;;  %v815_v32 = vshll.u32 %v2017_v23, 16  ;;  %v821_v33 = vshll.u32 %v2020_v24, 16  ;;  %v2032_v38 = vld [vmem:[%s1993_s29 + $0xc] sm:$0xf] }
  0x3c   : > { %v457_v34 = vor.u32 %v456_v26, %v453_v25  ;;  %v467_v35 = vor.u32 %v466_v28, %v462_v27  ;;  %v825_v36 = vshrl.u32 %v2020_v24, 16  ;;  %v831_v37 = vshll.u32 %v2023_v29, 16  ;;  %v2035_v39 = vld [vmem:[%s1993_s29 + $0x10] sm:$0xf]  ;;  %v2044_v48 = vld [vmem:[%s1993_s29 + $0x14] sm:$0x1] }
  0x3d   : > { %v814_v41 = vrot.slane %v812_v31, 4  ;;  %v817_v42 = vrot.slane %v815_v32, 5  ;;  %v823_v43 = vrot.slane %v821_v33, 5  ;;  %v475_v50 = vshrl.u32 %v2032_v38, 16  ;;  %v2050_v53 = vld [vmem:[%s2014_s5 + $0xc] sm:$0xf] }
  0x3e   : > { %v458_v44 = vrot.slane %v457_v34, 4  ;;  %v468_v45 = vrot.slane %v467_v35, 4  ;;  %v827_v46 = vrot.slane %v825_v36, 4  ;;  %v833_v47 = vrot.slane %v831_v37, 5  ;;  %v2061_v59 = vld [vmem:[%s2014_s5 + $0x10] sm:$0xf] }
  0x3f   : > { %v818_v49 = vor.u32 %v817_v42, %v814_v41  ;;  %v478_v51 = vshll.u32 %v2032_v38, 16  ;;  %v484_v52 = vshll.u32 %v2035_v39, 16  ;;  %v488_v58 = vshrl.u32 %v2035_v39, 16  ;;  %v2064_v0 = vld [vmem:[%s2014_s5 + $0x14] sm:$0x1]  ;;  %v1776_v37 = vld [vmem:[%s2229_s3 + $0x10] sm:$0xff]  }
  0x40   : > { %v463_v55 = vsel %vm2039_vm2, %v458_v44, %v462_v27  ;;  %v473_v56 = vsel %vm2039_vm2, %v468_v45, %v472_v30  ;;  %v828_v57 = vor.u32 %v827_v46, %v823_v43  ;;  %v477_v62 = vrot.slane %v475_v50, 4  ;;  %s1592_s19 = sshll.u32 (%p1955_p11), %s1493_s22, 3 }
  0x41   : > { %v1514_v60 = vcombine.low %v463_v55, %v473_v56  ;;  %v819_v61 = vrot.slane %v818_v49, 4  ;;  %v480_v63 = vrot.slane %v478_v51, 5  ;;  %v486_v2 = vrot.slane %v484_v52, 5  ;;  %s1347_s14 = scalar_lea.vmem (%p1955_p11), %s2230_s4, %s1592_s19 }
  0x42   : > { %v829_v1 = vrot.slane %v828_v57, 4  ;;  %v490_v3 = vrot.slane %v488_v58, 4  ;;  %v494_v4 = vshll.u32 %v2044_v48, 16  ;;  %v836_v7 = vshrl.u32 %v2050_v53, 16 }
  0x43   : > { %1622 = vmatprep.mubr.msk.bf16.mxu1 %vm513_vm3, %v1514_v60  ;;  %v824_v5 = vsel %vm2039_vm2, %v819_v61, %v823_v43  ;;  %v481_v6 = vor.u32 %v480_v63, %v477_v62  ;;  %v839_v11 = vshll.u32 %v2050_v53, 16  ;;  %v845_v18 = vshll.u32 %v2061_v59, 16 }
  0x44   : > { %v834_v8 = vsel %vm2039_vm2, %v829_v1, %v833_v47  ;;  %v491_v9 = vor.u32 %v490_v3, %v486_v2  ;;  %v496_v10 = vrot.slane %v494_v4, 5  ;;  %v838_v17 = vrot.slane %v836_v7, 4  ;;  %v2129_v1 = vld [vmem:[%s2123_s7 + $0x4] sm:$0xf] }
  0x45   : > { %v1542_v12 = vcombine.low %v824_v5, %v834_v8  ;;  %v482_v13 = vrot.slane %v481_v6, 4  ;;  %v841_v20 = vrot.slane %v839_v11, 5  ;;  %v849_v22 = vshrl.u32 %v2061_v59, 16  ;;  %v1780_v7 = vld [vmem:[%s2229_s3 + $0x18] sm:$0xff]  }
  0x46   : > { %v492_v19 = vrot.slane %v491_v9, 4  ;;  %v855_v25 = vshll.u32 %v2064_v0, 16  ;;  %v847_v27 = vrot.slane %v845_v18, 5  ;;  %v1519_v28 = vcombine.low %v1996_v14, %v1999_v15 }
  0x47   : > { %1646 = vmatprep.mubr.msk.bf16.mxu0 %vm513_vm3, %v1542_v12  ;;  %v487_v26 = vsel %vm2039_vm2, %v482_v13, %v486_v2  ;;  %v940_v30 = vrot.slane %v2023_v29, 5  ;;  %v842_v32 = vor.u32 %v841_v20, %v838_v17  ;;  %v851_v33 = vrot.slane %v849_v22, 4 }
  0x48   : > { %v497_v31 = vsel %vm2039_vm2, %v492_v19, %v496_v10  ;;  %v1547_v35 = vrot.slane %v2017_v23, 9  ;;  %v937_v36 = vrot.slane %v2020_v24, 5  ;;  %v857_v43 = vrot.slane %v855_v25, 5  ;;  %v441_v19 = vld [vmem:[%s2123_s7 + $0x8] sm:$0x1]  ;;  %v1778_v25 = vld [vmem:[%s2229_s3 + $0x38] sm:$0xff]  }
  0x49   : > { %v1515_v34 = vcombine.low %v487_v26, %v497_v31  ;;  %v843_v41 = vrot.slane %v842_v32, 4  ;;  %v852_v42 = vor.u32 %v851_v33, %v847_v27  ;;  %v647_v49 = vrot.slane %v1999_v15, 5  ;;  %v1774_v15 = vld [vmem:[%s2229_s3 + $0x30] sm:$0xff]  }
  0x4a   : > { %v938_v44 = vsel %vm2091_vm6, %v1547_v35, %v937_v36  ;;  %v939_v45 = vrot.slane %v937_v36, 4  ;;  %v650_v50 = vrot.slane %v2002_v16, 5  ;;  %v1524_v52 = vrot.slane %v1996_v14, 9  ;;  %v443_v31 = vld [vmem:[%s2123_s7 + $0x10] sm:$0xf] }
  0x4b   : > { %1623 = vmatmul.mubr.msk.bf16.vlgmr.msra.gmra.mrb[0].mxu1 %vm513_vm3, %v1515_v34  ;;  %v848_v46 = vsel %vm2039_vm2, %v843_v41, %v847_v27  ;;  %v853_v47 = vrot.slane %v852_v42, 4  ;;  %v944_v57 = vrot.slane %v2061_v59, 5  ;;  %v649_v58 = vrot.slane %v647_v49, 4 }
  0x4c   : > { %1627 = vmatpush3.bf16.msra.mxu1 %v1772_v54  ;;  %1628 = vmatprep.mubr.msk.bf16.mxu1 %vm513_vm3, %v1519_v28  ;;  %v941_v51 = vsel %vm2091_vm6, %v939_v45, %v940_v30  ;;  %v947_v16 = vrot.slane %v2064_v0, 5  ;;  %v648_v60 = vsel %vm2091_vm6, %v1524_v52, %v647_v49  ;;  %v1520_v61 = vcombine.low %v2032_v38, %v2035_v39  ;;  %v2126_v0 = vld [vmem:[%s2123_s7] sm:$0xf]  ;;  %v442_v30 = vld [vmem:[%s2123_s7 + $0xc] sm:$0xf] }
  0x4d   : > { %1632 = vmatprep.subr.bf16.mxu1 %v1776_v37  ;;  %v858_v55 = vsel %vm2039_vm2, %v853_v47, %v857_v43  ;;  %v1551_v56 = vcombine.low %v938_v44, %v941_v51  ;;  %v651_v14 = vsel %vm2091_vm6, %v649_v58, %v650_v50  ;;  %v1548_v62 = vrot.slane %v2050_v53, 9  ;;  %v444_v51 = vld [vmem:[%s2123_s7 + $0x14] sm:$0x1] }
  0x4e   : > { %v1543_v54 = vcombine.low %v848_v46, %v858_v55  ;;  %v946_v63 = vrot.slane %v944_v57, 4  ;;  %v1102_v2 = vshrl.u32 %v2126_v0, 16  ;;  %v1115_v3 = vshrl.u32 %v2129_v1, 16 }
  0x4f   : > { %v1111_v4 = vshll.u32 %v2129_v1, 16  ;;  %v1528_v5 = vcombine.low %v648_v60, %v651_v14  ;;  %v654_v6 = vrot.slane %v2035_v39, 5  ;;  %v945_v8 = vsel %vm2091_vm6, %v1548_v62, %v944_v57  ;;  %v1782_v57 = vld [vmem:[%s2229_s3 + $0x40] sm:$0xff]  }
  0x50   : > { %1647 = vmatmul.mubr.msk.bf16.vlgmr.msra.gmra.mrb[0].mxu0 %vm513_vm3, %v1543_v54  ;;  %v948_v9 = vsel %vm2091_vm6, %v946_v63, %v947_v16  ;;  %v1104_v10 = vrot.slane %v1102_v2, 4  ;;  %v1117_v13 = vrot.slane %v1115_v3, 4  ;;  %v657_v17 = vrot.slane %v2044_v48, 5 }
  0x51   : > { %1651 = vmatpush3.bf16.msra.mxu0 %v2011_v21  ;;  %1652 = vmatprep.mubr.msk.bf16.mxu0 %vm513_vm3, %v1551_v56  ;;  %v1105_v21 = vshll.u32 %v2126_v0, 16  ;;  %v1113_v12 = vrot.slane %v1111_v4, 5  ;;  %v1525_v39 = vrot.slane %v2032_v38, 9  ;;  %v656_v18 = vrot.slane %v654_v6, 4 }
  0x52   : > { %1656 = vmatprep.subr.bf16.mxu0 %v1774_v15  ;;  %v1552_v20 = vcombine.low %v945_v8, %v948_v9  ;;  %v1558_v22 = vcombine.low %v2126_v0, %v2129_v1  ;;  %v1121_v27 = vshll.u32 %v441_v19, 16  ;;  %v1126_v32 = vshrl.u32 %v442_v30, 16 }
  0x53   : > { %v1107_v11 = vrot.slane %v1105_v21, 5  ;;  %v1118_v48 = vor.u32 %v1117_v13, %v1113_v12  ;;  %v655_v28 = vsel %vm2091_vm6, %v1525_v39, %v654_v6  ;;  %v658_v38 = vsel %vm2091_vm6, %v656_v18, %v657_v17 }
  0x54   : > { %v1129_v33 = vshll.u32 %v442_v30, 16  ;;  %v1139_v34 = vshrl.u32 %v443_v31, 16  ;;  %v1135_v35 = vshll.u32 %v443_v31, 16  ;;  %v1529_v36 = vcombine.low %v655_v28, %v658_v38 }
  0x55   : > { %v1108_v26 = vor.u32 %v1107_v11, %v1104_v10  ;;  %v1119_v41 = vrot.slane %v1118_v48, 4  ;;  %v1123_v42 = vrot.slane %v1121_v27, 5  ;;  %v1535_v43 = vcombine.low %v2017_v23, %v2020_v24 }
  0x56   : > { %v1128_v44 = vrot.slane %v1126_v32, 4  ;;  %v1131_v45 = vrot.slane %v1129_v33, 5  ;;  %v1137_v46 = vrot.slane %v1135_v35, 5  ;;  %v1141_v47 = vrot.slane %v1139_v34, 4 }
  0x57   : > { %1629 = vmatmul.mubr.msk.bf16.vlgmr.msra.gmra.mrb[0].mxu1 %vm513_vm3, %v1520_v61  ;;  %v1124_v50 = vsel %vm2039_vm2, %v1119_v41, %v1123_v42  ;;  %v1559_v52 = vcombine.low %v442_v30, %v443_v31  ;;  %v1145_v24 = vshll.u32 %v444_v51, 16  ;;  %v1227_v58 = vrot.slane %v2129_v1, 5 }
  0x58   : > { %1633 = vmatpush3.bf16.msra.mxu1 %v1776_v37  ;;  %1634 = vmatprep.mubr.msk.bf16.mxu1 %vm513_vm3, %v1528_v5  ;;  %v1109_v37 = vrot.slane %v1108_v26, 4  ;;  %v1132_v56 = vor.u32 %v1131_v45, %v1128_v44  ;;  %v1142_v23 = vor.u32 %v1141_v47, %v1137_v46  ;;  %v1536_v60 = vcombine.low %v2050_v53, %v2061_v59 }
  0x59   : > { %1638 = vmatprep.subr.bf16.mxu1 %v1780_v7  ;;  %v1147_v16 = vrot.slane %v1145_v24, 5  ;;  %v1570_v14 = vrot.slane %v2126_v0, 9  ;;  %v1229_v61 = vrot.slane %v1227_v58, 4  ;;  %v1230_v62 = vrot.slane %v441_v19, 5 }
  0x5a   : > { %v1114_v49 = vsel %vm2039_vm2, %v1109_v37, %v1113_v12  ;;  %v1133_v54 = vrot.slane %v1132_v56, 4  ;;  %v1234_v59 = vrot.slane %v443_v31, 5  ;;  %v1571_v0 = vrot.slane %v442_v30, 9 }
  0x5b   : > { %v1565_v55 = vcombine.low %v1114_v49, %v1124_v50  ;;  %v1228_v2 = vsel %vm2091_vm6, %v1570_v14, %v1227_v58  ;;  %v1231_v21 = vsel %vm2091_vm6, %v1229_v61, %v1230_v62  ;;  %v1237_v4 = vrot.slane %v444_v51, 5 }
  0x5c   : > { %1653 = vmatmul.mubr.msk.bf16.vlgmr.msra.gmra.mrb[0].mxu0 %vm513_vm3, %v1552_v20  ;;  %v1138_v63 = vsel %vm2039_vm2, %v1133_v54, %v1137_v46  ;;  %v1574_v53 = vcombine.low %v1228_v2, %v1231_v21  ;;  %v1236_v40 = vrot.slane %v1234_v59, 4  ;;  %v1235_v5 = vsel %vm2091_vm6, %v1571_v0, %v1234_v59 }
  0x5d   : > { %1657 = vmatpush3.bf16.msra.mxu0 %v1774_v15  ;;  %1658 = vmatprep.mubr.msk.bf16.mxu0 %vm513_vm3, %v1558_v22  ;;  %v1143_v15 = vrot.slane %v1142_v23, 4 }
  0x5e   : > { %1662 = vmatprep.subr.bf16.mxu0 %v1778_v25  ;;  %v1238_v6 = vsel %vm2091_vm6, %v1236_v40, %v1237_v4 }
  0x5f   : > { %v1148_v1 = vsel %vm2039_vm2, %v1143_v15, %v1147_v16 }
  0x60   : > { %v1566_v3 = vcombine.low %v1138_v63, %v1148_v1 }
  0x63   : > { %1635 = vmatmul.mubr.msk.bf16.vlgmr.msra.gmra.mrb[0].mxu1 %vm513_vm3, %v1529_v36 }
  0x64   : > { %1639 = vmatpush3.bf16.msra.mxu1 %v1780_v7  ;;  %1640 = vmatprep.mubr.msk.bf16.mxu1 %vm513_vm3, %v1535_v43  ;;  %v1575_v7 = vcombine.low %v1235_v5, %v1238_v6 }
  0x68   : > { %1659 = vmatmul.mubr.msk.bf16.vlgmr.msra.gmra.mrb[0].mxu0 %vm513_vm3, %v1559_v52 }
  0x69   : > { %1663 = vmatpush3.bf16.msra.mxu0 %v1778_v25  ;;  %1664 = vmatprep.mubr.msk.bf16.mxu0 %vm513_vm3, %v1565_v55 }
  0x6a   : > { %1668 = vmatprep.subr.bf16.mxu0 %v1782_v57 }
  0x6f   : > { %1641 = vmatmul.mubr.msk.bf16.vlgmr.msra.gmra.mrb[0].mxu1 %vm513_vm3, %v1536_v60 }
  0x74   : > { %1665 = vmatmul.mubr.msk.bf16.vlgmr.msra.gmra.mrb[0].mxu0 %vm513_vm3, %v1566_v3 }
  0x75   : > { %1669 = vmatpush3.bf16.msra.mxu0 %v1782_v57  ;;  %1670 = vmatprep.mubr.msk.bf16.mxu0 %vm513_vm3, %v1574_v53 }
  0x80   : > { %1671 = vmatmul.mubr.msk.bf16.vlgmr.msra.gmra.mrb[0].mxu0 %vm513_vm3, %v1575_v7 }
 0x142   : > { %v1642_v8 = vpop.f32.mrb[0].mxu1 }
 0x143   : > { %v792_v9 = vpop.f32.mrb[1].mxu1 }
 0x144   : > { %v1643_v10 = vpop.f32.mrb[2].mxu1 }
 0x145   : > { %v795_v11 = vpop.f32.mrb[3].mxu1 }
 0x153   : > { %v1672_v12 = vpop.f32.mrb[0].mxu0 }
 0x154   : > { %v1674_v13 = vadd.f32 %v1672_v12, %v1642_v8  ;;  %v1294_v17 = vpop.f32.mrb[1].mxu0 }
 0x155   : > { %v1675_v39 = vadd.f32 %v1294_v17, %v792_v9  ;;  %v1673_v18 = vpop.f32.mrb[2].mxu0 }
 0x156   : > { %v1315_v19 = vmax.f32 %v1674_v13, 0.0  ;;  %v1676_v20 = vadd.f32 %v1673_v18, %v1643_v10  ;;  %v1297_v22 = vpop.f32.mrb[3].mxu0 }
 0x157   : > { %v1313_v29 = vmax.f32 %v1675_v39, 0.0  ;;  %v1677_v25 = vadd.f32 %v1297_v22, %v795_v11  ;;  %1344 = sbr.rel (!%p1955_p11) target bundleno = 358 (0x166), region = 163 }
 0x158   : > { %v1590_v26 = vpack.c.bf16 %v1315_v19, %v1315_v19  ;;  %v1316_v48 = vmax.f32 %v1676_v20, 0.0 }
 0x159   : > { %v1588_v27 = vpack.c.bf16 %v1313_v29, %v1313_v29  ;;  %v1314_v28 = vmax.f32 %v1677_v25, 0.0 }
 0x15a   : > { %1336 = vst.msk [vmem:[%s423_s12 + $0x8] sm:$0xf] %vm1333_vm7, %v1590_v26  ;;  %v1591_v38 = vpack.c.bf16 %v1316_v48, %v1316_v48 }
 0x15b   : > { %1334 = vst.msk [vmem:[%s423_s12] sm:$0xf] %vm1333_vm7, %v1588_v27  ;;  %v1589_v30 = vpack.c.bf16 %v1314_v28, %v1314_v28 }
 0x15c   : > { %1337 = vst.msk [vmem:[%s423_s12 + $0xc] sm:$0xf] %vm1333_vm7, %v1591_v38 }
 0x15d   : > { %1335 = vst.msk [vmem:[%s423_s12 + $0x4] sm:$0xf] %vm1333_vm7, %v1589_v30 }
 0x163   : > { %v1367_v32 = vld [vmem:[%s423_s12 + $0x8] sm:$0xff]  }
 0x164   : > { %v1363_v31 = vld [vmem:[%s423_s12] sm:$0xff]   ;;  %1368 = vst [vmem:[%s1347_s14 + $0x80] sm:$0xff] %v1367_v32  }
 0x165   : > { %1364 = vst [vmem:[%s1347_s14] sm:$0xff] %v1363_v31  }
 0x166 PF: > { %p11_p2 = scmp.ge.s32.totalorder %s1902_s23, 18   ;;  %s2239_s15 = smov %s1818_s16 }
 0x167   : > { %s2240_s16 = smov %s1944_s11  ;;  %s2241_s17 = smov %s1826_s18 }
 0x168   : > { %s2242_s18 = smov %s1929_s6  ;;  %s2243_s19 = smov %s1834_s20 }
 0x169   : > { %s2244_s20 = smov %s1912_s27  ;;  %s2245_s21 = smov %s1902_s23 }
 0x16a   :  { %13 = sbr.rel (!%p11_p2) target bundleno = 4 (0x4), region = 259 }

</bundles_post_ra>
